<compile_context>
chip_gen: v5e
topology: v5e:2x2
jax: 0.10.0
libtpu: 0.0.40
codegen_flags: <defaults>
</compile_context>

<pallas_src>
import functools

import jax
import jax.numpy as jnp
from jax.experimental import pallas as pl
from jax.experimental.pallas import tpu as pltpu

IN_FEATURES = 3
OUT_FEATURES = 3
LANES = 128


def linear_hardswish_kernel(w_ref, b_ref, x_ref, o_ref):
    """One batch tile, feature-major / batch-lane-dense layout.

    w_ref : (out, in)     f32 in SMEM   (PyTorch nn.Linear layout)
    b_ref : (out,)        f32 in SMEM
    x_ref : (in,  R, 128) f32 in VMEM   (batch on sublane x lane axes)
    o_ref : (out, R, 128) f32 in VMEM
    """
    # Full-width input slabs, one per input feature.
    x0 = x_ref[0]                                   # (R, 128)
    x1 = x_ref[1]
    x2 = x_ref[2]

    for o in range(OUT_FEATURES):
        # Unrolled VPU contraction over K=3: SMEM scalar * lane-dense slab.
        l1 = (w_ref[o, 0] * x0
              + w_ref[o, 1] * x1
              + w_ref[o, 2] * x2
              + b_ref[o])
        # hardswish: l1 * clamp(l1 + 3, 0, 6) / 6
        l3 = l1 * jnp.clip(l1 + 3.0, 0.0, 6.0) * (1.0 / 6.0)
        o_ref[o] = l3.astype(o_ref.dtype)           # direct lane-dense row store


def _round_up(n, m):
    return ((n + m - 1) // m) * m


@functools.partial(jax.jit, static_argnames=("block_rows",))
def linear_hardswish(x, weight, bias, *, block_rows=512):
    """x: (B, 3) f32; weight: (3, 3) PyTorch (out, in); bias: (3,) f32."""
    B, K = x.shape
    O = weight.shape[0]
    assert K == IN_FEATURES and O == OUT_FEATURES and weight.shape[1] == K

    # ---- lane-dense relayout (layout plumbing only) ----
    # (B, 3) -> (3, B) -> pad lane tail to 128 -> (3, NB, 128)
    bp = _round_up(B, LANES)
    xt = x.T                                        # (3, B)
    if bp != B:
        xt = jnp.pad(xt, ((0, 0), (0, bp - B)))     # <=127-element tail only
    nb = bp // LANES
    x3 = xt.reshape(K, nb, LANES)

    # Rows of 128-wide slabs per grid step.  Multiple of 8 (sublanes) or the
    # full extent; 512 -> 768 KiB/block, big enough to amortize step overhead,
    # small enough that double-buffered in+out stays a few MiB of VMEM.
    r = min(block_rows, nb)
    grid = (pl.cdiv(nb, r),)

    out3 = pl.pallas_call(
        linear_hardswish_kernel,
        out_shape=jax.ShapeDtypeStruct((O, nb, LANES), x.dtype),
        grid=grid,
        in_specs=[
            pl.BlockSpec(memory_space=pltpu.MemorySpace.SMEM),    # weight
            pl.BlockSpec(memory_space=pltpu.MemorySpace.SMEM),    # bias
            pl.BlockSpec((K, r, LANES), lambda i: (0, i, 0)),     # x tile
        ],
        out_specs=pl.BlockSpec((O, r, LANES), lambda i: (0, i, 0)),
        compiler_params=pltpu.CompilerParams(
            # Batch axis is embarrassingly parallel -> megacore sharding on v7x.
            dimension_semantics=("parallel",),
        ),
        cost_estimate=pl.CostEstimate(
            flops=bp * (2 * K * O + 4 * O),
            transcendentals=0,
            bytes_accessed=(bp * K + bp * O + K * O + O) * 4,
        ),
    )(weight, bias, x3)

    # ---- relayout back: (3, NB, 128) -> (3, Bp) -> (B, 3) ----
    return out3.reshape(O, bp)[:, :B].T


def reference(x, weight, bias):
    l1 = x @ weight.T + bias
    l2 = l1 * jnp.clip(l1 + 3.0, 0.0, 6.0)
    return l2 / 6.0


if __name__ == "__main__":
    key = jax.random.PRNGKey(0)
    k_x, k_w, k_b = jax.random.split(key, 3)

    # Deterministic Linear(3, 3) parameters (PyTorch-style uniform init).
    bound = 1.0 / (IN_FEATURES ** 0.5)
    weight = jax.random.uniform(k_w, (OUT_FEATURES, IN_FEATURES),
                                minval=-bound, maxval=bound, dtype=jnp.float32)
    bias = jax.random.uniform(k_b, (OUT_FEATURES,),
                              minval=-bound, maxval=bound, dtype=jnp.float32)

    # Module input: i = torch.randn(1, 3)
    x = jax.random.normal(k_x, (1, IN_FEATURES), dtype=jnp.float32)
    out = jax.block_until_ready(linear_hardswish(x, weight, bias))
    ref = reference(x, weight, bias)
    assert out.shape == ref.shape, (out.shape, ref.shape)
    assert jnp.allclose(out, ref, atol=1e-5, rtol=1e-5), (out, ref)

    # Extra check: ragged last grid block + multi-step grid (masked tail path).
    xb = jax.random.normal(k_x, (1300, IN_FEATURES), dtype=jnp.float32)
    outb = jax.block_until_ready(linear_hardswish(xb, weight, bias, block_rows=8))
    refb = reference(xb, weight, bias)
    assert outb.shape == refb.shape, (outb.shape, refb.shape)
    assert jnp.allclose(outb, refb, atol=1e-5, rtol=1e-5)

    print("KERNEL_OK")
</pallas_src>

<mosaic_0001>
module attributes {stable_mosaic.version = 11 : i64} {
  func.func @linear_hardswish_kernel(%arg0: i32, %arg1: memref<3x3xf32, #tpu.memory_space<smem>>, %arg2: memref<3xf32, #tpu.memory_space<smem>>, %arg3: memref<3x1x128xf32, #tpu.memory_space<vmem>>, %arg4: memref<3x1x128xf32, #tpu.memory_space<vmem>>) attributes {dimension_semantics = [#tpu.dimension_semantics<parallel>], iteration_bounds = array<i64: 1>, scalar_prefetch = 0 : i64, scratch_operands = 0 : i64, tpu.core_type = #tpu.core_type<tc>, window_params = [{transform_indices = @transform_0, window_bounds = array<i64: 3, 3>}, {transform_indices = @transform_1, window_bounds = array<i64: 3>}, {transform_indices = @transform_2, window_bounds = array<i64: 3, 1, 128>}, {transform_indices = @transform_3, window_bounds = array<i64: 3, 1, 128>}]} {
    %c0 = arith.constant 0 : index
    %c0_0 = arith.constant 0 : index
    %c0_1 = arith.constant 0 : index
    %0 = vector.load %arg3[%c0, %c0_0, %c0_1] : memref<3x1x128xf32, #tpu.memory_space<vmem>>, vector<1x1x128xf32>
    %1 = vector.shape_cast %0 : vector<1x1x128xf32> to vector<1x128xf32>
    %c1 = arith.constant 1 : index
    %c0_2 = arith.constant 0 : index
    %c0_3 = arith.constant 0 : index
    %2 = vector.load %arg3[%c1, %c0_2, %c0_3] : memref<3x1x128xf32, #tpu.memory_space<vmem>>, vector<1x1x128xf32>
    %3 = vector.shape_cast %2 : vector<1x1x128xf32> to vector<1x128xf32>
    %c2 = arith.constant 2 : index
    %c0_4 = arith.constant 0 : index
    %c0_5 = arith.constant 0 : index
    %4 = vector.load %arg3[%c2, %c0_4, %c0_5] : memref<3x1x128xf32, #tpu.memory_space<vmem>>, vector<1x1x128xf32>
    %5 = vector.shape_cast %4 : vector<1x1x128xf32> to vector<1x128xf32>
    %c0_6 = arith.constant 0 : index
    %c0_7 = arith.constant 0 : index
    %6 = memref.load %arg1[%c0_6, %c0_7] : memref<3x3xf32, #tpu.memory_space<smem>>
    %7 = vector.broadcast %6 : f32 to vector<1x128xf32>
    %8 = arith.mulf %7, %1 : vector<1x128xf32>
    %c0_8 = arith.constant 0 : index
    %c1_9 = arith.constant 1 : index
    %9 = memref.load %arg1[%c0_8, %c1_9] : memref<3x3xf32, #tpu.memory_space<smem>>
    %10 = vector.broadcast %9 : f32 to vector<1x128xf32>
    %11 = arith.mulf %10, %3 : vector<1x128xf32>
    %12 = arith.addf %8, %11 : vector<1x128xf32>
    %c0_10 = arith.constant 0 : index
    %c2_11 = arith.constant 2 : index
    %13 = memref.load %arg1[%c0_10, %c2_11] : memref<3x3xf32, #tpu.memory_space<smem>>
    %14 = vector.broadcast %13 : f32 to vector<1x128xf32>
    %15 = arith.mulf %14, %5 : vector<1x128xf32>
    %16 = arith.addf %12, %15 : vector<1x128xf32>
    %c0_12 = arith.constant 0 : index
    %17 = memref.load %arg2[%c0_12] : memref<3xf32, #tpu.memory_space<smem>>
    %18 = vector.broadcast %17 : f32 to vector<1x128xf32>
    %19 = arith.addf %16, %18 : vector<1x128xf32>
    %cst = arith.constant 3.000000e+00 : f32
    %20 = vector.broadcast %cst : f32 to vector<1x128xf32>
    %21 = arith.addf %19, %20 : vector<1x128xf32>
    %cst_13 = arith.constant 0.000000e+00 : f32
    %cst_14 = arith.constant 6.000000e+00 : f32
    %22 = vector.broadcast %cst_13 : f32 to vector<1x128xf32>
    %23 = arith.maximumf %22, %21 : vector<1x128xf32>
    %24 = vector.broadcast %cst_14 : f32 to vector<1x128xf32>
    %25 = arith.minimumf %24, %23 : vector<1x128xf32>
    %26 = arith.mulf %19, %25 : vector<1x128xf32>
    %cst_15 = arith.constant 0.166666672 : f32
    %27 = vector.broadcast %cst_15 : f32 to vector<1x128xf32>
    %28 = arith.mulf %26, %27 : vector<1x128xf32>
    %c0_16 = arith.constant 0 : index
    %c0_17 = arith.constant 0 : index
    %c0_18 = arith.constant 0 : index
    %29 = vector.load %arg4[%c0_16, %c0_17, %c0_18] : memref<3x1x128xf32, #tpu.memory_space<vmem>>, vector<1x1x128xf32>
    %30 = vector.shape_cast %29 : vector<1x1x128xf32> to vector<1x128xf32>
    %31 = vector.shape_cast %28 : vector<1x128xf32> to vector<1x1x128xf32>
    tpu.vector_store %arg4[%c0_16, %c0_17, %c0_18], %31 {strides = array<i32>} : memref<3x1x128xf32, #tpu.memory_space<vmem>>, vector<1x1x128xf32>,
    %c1_19 = arith.constant 1 : index
    %c0_20 = arith.constant 0 : index
    %32 = memref.load %arg1[%c1_19, %c0_20] : memref<3x3xf32, #tpu.memory_space<smem>>
    %33 = vector.broadcast %32 : f32 to vector<1x128xf32>
    %34 = arith.mulf %33, %1 : vector<1x128xf32>
    %c1_21 = arith.constant 1 : index
    %c1_22 = arith.constant 1 : index
    %35 = memref.load %arg1[%c1_21, %c1_22] : memref<3x3xf32, #tpu.memory_space<smem>>
    %36 = vector.broadcast %35 : f32 to vector<1x128xf32>
    %37 = arith.mulf %36, %3 : vector<1x128xf32>
    %38 = arith.addf %34, %37 : vector<1x128xf32>
    %c1_23 = arith.constant 1 : index
    %c2_24 = arith.constant 2 : index
    %39 = memref.load %arg1[%c1_23, %c2_24] : memref<3x3xf32, #tpu.memory_space<smem>>
    %40 = vector.broadcast %39 : f32 to vector<1x128xf32>
    %41 = arith.mulf %40, %5 : vector<1x128xf32>
    %42 = arith.addf %38, %41 : vector<1x128xf32>
    %c1_25 = arith.constant 1 : index
    %43 = memref.load %arg2[%c1_25] : memref<3xf32, #tpu.memory_space<smem>>
    %44 = vector.broadcast %43 : f32 to vector<1x128xf32>
    %45 = arith.addf %42, %44 : vector<1x128xf32>
    %cst_26 = arith.constant 3.000000e+00 : f32
    %46 = vector.broadcast %cst_26 : f32 to vector<1x128xf32>
    %47 = arith.addf %45, %46 : vector<1x128xf32>
    %cst_27 = arith.constant 0.000000e+00 : f32
    %cst_28 = arith.constant 6.000000e+00 : f32
    %48 = vector.broadcast %cst_27 : f32 to vector<1x128xf32>
    %49 = arith.maximumf %48, %47 : vector<1x128xf32>
    %50 = vector.broadcast %cst_28 : f32 to vector<1x128xf32>
    %51 = arith.minimumf %50, %49 : vector<1x128xf32>
    %52 = arith.mulf %45, %51 : vector<1x128xf32>
    %cst_29 = arith.constant 0.166666672 : f32
    %53 = vector.broadcast %cst_29 : f32 to vector<1x128xf32>
    %54 = arith.mulf %52, %53 : vector<1x128xf32>
    %c1_30 = arith.constant 1 : index
    %c0_31 = arith.constant 0 : index
    %c0_32 = arith.constant 0 : index
    %55 = vector.load %arg4[%c1_30, %c0_31, %c0_32] : memref<3x1x128xf32, #tpu.memory_space<vmem>>, vector<1x1x128xf32>
    %56 = vector.shape_cast %55 : vector<1x1x128xf32> to vector<1x128xf32>
    %57 = vector.shape_cast %54 : vector<1x128xf32> to vector<1x1x128xf32>
    tpu.vector_store %arg4[%c1_30, %c0_31, %c0_32], %57 {strides = array<i32>} : memref<3x1x128xf32, #tpu.memory_space<vmem>>, vector<1x1x128xf32>,
    %c2_33 = arith.constant 2 : index
    %c0_34 = arith.constant 0 : index
    %58 = memref.load %arg1[%c2_33, %c0_34] : memref<3x3xf32, #tpu.memory_space<smem>>
    %59 = vector.broadcast %58 : f32 to vector<1x128xf32>
    %60 = arith.mulf %59, %1 : vector<1x128xf32>
    %c2_35 = arith.constant 2 : index
    %c1_36 = arith.constant 1 : index
    %61 = memref.load %arg1[%c2_35, %c1_36] : memref<3x3xf32, #tpu.memory_space<smem>>
    %62 = vector.broadcast %61 : f32 to vector<1x128xf32>
    %63 = arith.mulf %62, %3 : vector<1x128xf32>
    %64 = arith.addf %60, %63 : vector<1x128xf32>
    %c2_37 = arith.constant 2 : index
    %c2_38 = arith.constant 2 : index
    %65 = memref.load %arg1[%c2_37, %c2_38] : memref<3x3xf32, #tpu.memory_space<smem>>
    %66 = vector.broadcast %65 : f32 to vector<1x128xf32>
    %67 = arith.mulf %66, %5 : vector<1x128xf32>
    %68 = arith.addf %64, %67 : vector<1x128xf32>
    %c2_39 = arith.constant 2 : index
    %69 = memref.load %arg2[%c2_39] : memref<3xf32, #tpu.memory_space<smem>>
    %70 = vector.broadcast %69 : f32 to vector<1x128xf32>
    %71 = arith.addf %68, %70 : vector<1x128xf32>
    %cst_40 = arith.constant 3.000000e+00 : f32
    %72 = vector.broadcast %cst_40 : f32 to vector<1x128xf32>
    %73 = arith.addf %71, %72 : vector<1x128xf32>
    %cst_41 = arith.constant 0.000000e+00 : f32
    %cst_42 = arith.constant 6.000000e+00 : f32
    %74 = vector.broadcast %cst_41 : f32 to vector<1x128xf32>
    %75 = arith.maximumf %74, %73 : vector<1x128xf32>
    %76 = vector.broadcast %cst_42 : f32 to vector<1x128xf32>
    %77 = arith.minimumf %76, %75 : vector<1x128xf32>
    %78 = arith.mulf %71, %77 : vector<1x128xf32>
    %cst_43 = arith.constant 0.166666672 : f32
    %79 = vector.broadcast %cst_43 : f32 to vector<1x128xf32>
    %80 = arith.mulf %78, %79 : vector<1x128xf32>
    %c2_44 = arith.constant 2 : index
    %c0_45 = arith.constant 0 : index
    %c0_46 = arith.constant 0 : index
    %81 = vector.load %arg4[%c2_44, %c0_45, %c0_46] : memref<3x1x128xf32, #tpu.memory_space<vmem>>, vector<1x1x128xf32>
    %82 = vector.shape_cast %81 : vector<1x1x128xf32> to vector<1x128xf32>
    %83 = vector.shape_cast %80 : vector<1x128xf32> to vector<1x1x128xf32>
    tpu.vector_store %arg4[%c2_44, %c0_45, %c0_46], %83 {strides = array<i32>} : memref<3x1x128xf32, #tpu.memory_space<vmem>>, vector<1x1x128xf32>,
    return
  }
  func.func @transform_0(%arg0: i32) -> (i32, i32) {
    %c0_i32 = arith.constant 0 : i32
    %c0_i32_0 = arith.constant 0 : i32
    %c0_i32_1 = arith.constant 0 : i32
    return %c0_i32, %c0_i32_0 : i32, i32
  }
  func.func @transform_1(%arg0: i32) -> i32 {
    %c0_i32 = arith.constant 0 : i32
    %c0_i32_0 = arith.constant 0 : i32
    return %c0_i32 : i32
  }
  func.func @transform_2(%arg0: i32) -> (i32, i32, i32) {
    %c0_i32 = arith.constant 0 : i32
    %c0_i32_0 = arith.constant 0 : i32
    %c0_i32_1 = arith.constant 0 : i32
    return %c0_i32, %arg0, %c0_i32_0 : i32, i32, i32
  }
  func.func @transform_3(%arg0: i32) -> (i32, i32, i32) {
    %c0_i32 = arith.constant 0 : i32
    %c0_i32_0 = arith.constant 0 : i32
    %c0_i32_1 = arith.constant 0 : i32
    return %c0_i32, %arg0, %c0_i32_0 : i32, i32, i32
  }
}

</mosaic_0001>

<bundles_post_ra>
// kernel: linear_hardswish.1
= control target key start
LH: loop header
LB: loop body
LE: loop exit
PB: predicated region body
PF: predicated region fallthrough
CT: control target
= control target key end

     0   :  { %8 = vsyncpa [#allocation3], 0  ;;  %s202_s0 = inlined_call_operand.vmem [shape: f32[3,3], index: 0, kind: input, shape index: {}]   ;;  %s203_s1 = inlined_call_operand.vmem [shape: f32[3], index: 1, kind: input, shape index: {}]   ;;  %s204_s2 = inlined_call_operand.vmem [shape: f32[3,1,128], index: 2, kind: input, shape index: {}]   ;;  %s205_s3 = inlined_call_operand.vmem [shape: f32[3,1,128], index: 3, kind: output, shape index: {}]  }
   0x1   :  { %s15_s14 = sshll.u32 %s202_s0, 4  ;;  %s16_s14 = int_to_ptr.vmem [resolvable:$true] %s15_s14 }
   0x2   :  { %9 = vsyncpa [#allocation5], 0  ;;  %s24_s17 = sshll.u32 %s203_s1, 4  ;;  %s156_s18 = smov [#allocation2]   ;;  %s25_s17 = int_to_ptr.vmem [resolvable:$true] %s24_s17 }
   0x3   :  { %18 = dma.vmem_to_smem %s16_s14, 64, %s156_s18, [#allocation3]  }
   0x4   :  { %s157_s19 = smov [#allocation4]  }
   0x5   :  { %27 = dma.vmem_to_smem %s25_s17, 16, %s157_s19, [#allocation5]  }
   0x6   :  { %152 = dma.done.wait [#allocation3], 64  }
   0x7   :  { %153 = vsyncadd [#allocation3], 4294967232 }
   0x8   :  { %154 = dma.done.wait [#allocation5], 16  }
   0x9   :  { %155 = vsyncadd [#allocation5], 4294967280 }
   0xa   :  { %38 = sfence }
   0xb   :  { %s44_s20 = sld [smem:[#allocation2]]  ;;  %v39_v0 = vld [vmem:[%s204_s2] sm:$0x1]  ;;  %v112_v1 = vld [vmem:[%s204_s2 + $0x1] sm:$0x1] }
   0xc   :  { %s114_s21 = sld [smem:[#allocation2 + $0x1]]  ;;  %v113_v2 = vld [vmem:[%s204_s2 + $0x2] sm:$0x1] }
   0xd   :  { %s115_s22 = sld [smem:[#allocation2 + $0x2]] }
   0xe   :  { %s55_s0 = sld [smem:[#allocation4]] }
   0xf   :  { %s116_s25 = sld [smem:[#allocation2 + $0x80]] }
  0x10   :  { %s117_s27 = sld [smem:[#allocation2 + $0x81]] }
  0x11   :  { %v45_v3 = vstv %s44_s20  ;;  %s118_s30 = sld [smem:[#allocation2 + $0x82]] }
  0x12   :  { %v46_v4 = vmul.f32 %v45_v3, %v39_v0  ;;  %v48_v5 = vstv %s114_s21  ;;  %s119_s4 = sld [smem:[#allocation4 + $0x1]] }
  0x13   :  { %v49_v6 = vmul.f32 %v112_v1, %v48_v5  ;;  %v52_v7 = vstv %s115_s22  ;;  %s121_s5 = sld [smem:[#allocation2 + $0x100]] }
  0x14   :  { %v53_v8 = vmul.f32 %v113_v2, %v52_v7  ;;  %s122_s6 = sld [smem:[#allocation2 + $0x101]]  ;;  %v56_v11 = vstv %s55_s0 }
  0x15   :  { %v50_v9 = vadd.f32 %v49_v6, %v46_v4  ;;  %v65_v10 = vstv %s116_s25  ;;  %s123_s7 = sld [smem:[#allocation2 + $0x102]] }
  0x16   :  { %v66_v12 = vmul.f32 %v65_v10, %v39_v0  ;;  %v68_v13 = vstv %s117_s27  ;;  %s124_s8 = sld [smem:[#allocation4 + $0x2]] }
  0x17   :  { %v54_v14 = vadd.f32 %v53_v8, %v50_v9  ;;  %v69_v15 = vmul.f32 %v112_v1, %v68_v13  ;;  %v72_v16 = vstv %s118_s30 }
  0x18   :  { %v73_v17 = vmul.f32 %v113_v2, %v72_v16  ;;  %v76_v21 = vstv %s119_s4 }
  0x19   :  { %v57_v18 = vadd.f32 %v56_v11, %v54_v14  ;;  %v70_v19 = vadd.f32 %v69_v15, %v66_v12  ;;  %v86_v20 = vstv %s121_s5 }
  0x1a   :  { %v87_v22 = vmul.f32 %v86_v20, %v39_v0  ;;  %v89_v23 = vstv %s122_s6 }
  0x1b   :  { %v58_v24 = vadd.f32 3.0, %v57_v18  ;;  %v74_v25 = vadd.f32 %v73_v17, %v70_v19  ;;  %v90_v26 = vmul.f32 %v112_v1, %v89_v23  ;;  %v93_v27 = vstv %s123_s7 }
  0x1c   :  { %v94_v28 = vmul.f32 %v113_v2, %v93_v27  ;;  %v97_v32 = vstv %s124_s8 }
  0x1d   :  { %v59_v29 = vmax.f32 %v58_v24, 0.0  ;;  %v77_v30 = vadd.f32 %v76_v21, %v74_v25  ;;  %v91_v31 = vadd.f32 %v90_v26, %v87_v22 }
  0x1f   :  { %v60_v33 = vmin.f32 %v59_v29, 6.0  ;;  %v78_v34 = vadd.f32 3.0, %v77_v30  ;;  %v95_v35 = vadd.f32 %v94_v28, %v91_v31 }
  0x21   :  { %v61_v36 = vmul.f32 %v60_v33, %v57_v18  ;;  %v79_v37 = vmax.f32 %v78_v34, 0.0  ;;  %v98_v38 = vadd.f32 %v97_v32, %v95_v35 }
  0x23   :  { %v62_v39 = vmul.f32 0.16666667, %v61_v36  ;;  %v80_v40 = vmin.f32 %v79_v37, 6.0  ;;  %v99_v41 = vadd.f32 3.0, %v98_v38 }
  0x25   :  { %63 = vst [vmem:[%s205_s3] sm:$0x1] %v62_v39  ;;  %v81_v42 = vmul.f32 %v80_v40, %v77_v30  ;;  %v100_v43 = vmax.f32 %v99_v41, 0.0 }
  0x27   :  { %v82_v44 = vmul.f32 0.16666667, %v81_v42  ;;  %v101_v45 = vmin.f32 %v100_v43, 6.0 }
  0x29   :  { %120 = vst [vmem:[%s205_s3 + $0x1] sm:$0x1] %v82_v44  ;;  %v102_v46 = vmul.f32 %v101_v45, %v98_v38 }
  0x2b   :  { %v103_v47 = vmul.f32 0.16666667, %v102_v46 }
  0x2d   :  { %125 = vst [vmem:[%s205_s3 + $0x2] sm:$0x1] %v103_v47 }
  0x2e   :  { %110 = vsyncpa [#allocation3], 1 }
  0x2f   :  { %111 = vsyncpa [#allocation5], 1 }

</bundles_post_ra>
